<compile_context>
chip_gen: v5e
topology: v5e:2x2
jax: 0.10.0
libtpu: 0.0.40
codegen_flags: <defaults>
</compile_context>

<pallas_src>
import functools
import math

import jax
import jax.numpy as jnp
from jax import lax
from jax.experimental import pallas as pl
from jax.experimental.pallas import tpu as pltpu


def _multilabel_con_loss_kernel(
    qlab_ref,   # [TQ, 2] i32  labels of the anchor rows of this q tile
    klab_ref,   # [2, TK] i32  labels of the contrast columns of this k tile
    q_ref,      # [TQ, D]      anchor features
    k_ref,      # [TK, D]      contrast features (same HBM buffer as q_ref)
    out_ref,    # [TQ, 1] f32  per-row combined weighted loss (written on last k step)
    *scratch,   # per-row online-softmax state, each [TQ, 1] f32
    inv_t1, inv_t2, coef1, coef2, shared, n_valid,
):
    if shared:
        m1, z1, p1, c1, p2, c2 = scratch
    else:
        m1, z1, p1, c1, m2, z2, p2, c2 = scratch

    i = pl.program_id(0)   # q-tile index ("parallel")
    j = pl.program_id(1)   # k-tile index ("arbitrary" reduction)
    nk = pl.num_programs(1)

    @pl.when(j == 0)
    def _init():
        neg_inf = jnp.full(m1.shape, -jnp.inf, dtype=jnp.float32)
        zero = jnp.zeros(m1.shape, dtype=jnp.float32)
        m1[...] = neg_inf
        z1[...] = zero
        p1[...] = zero
        c1[...] = zero
        p2[...] = zero
        c2[...] = zero
        if not shared:
            m2[...] = neg_inf
            z2[...] = zero

    # [TQ, TK] similarities on the MXU, contracting the feature dim of BOTH tiles
    # (no pre-transposed [D, N] copy exists in HBM; f32 accumulation regardless of
    # the input dtype).
    dots = lax.dot_general(
        q_ref[...], k_ref[...],
        dimension_numbers=(((1,), (1,)), ((), ())),
        preferred_element_type=jnp.float32,
    )
    tq, tk = dots.shape

    s1 = dots * inv_t1
    s2 = s1 if shared else dots * inv_t2

    qlab = qlab_ref[...]                # [TQ, 2]
    klab = klab_ref[...]                # [2, TK]
    pos1_raw = qlab[:, 0:1] == klab[0:1, :]
    pos2_raw = qlab[:, 1:2] == klab[1:2, :]

    # This tile only needs the logits_mask if it touches the global diagonal
    # (self-contrast) or the padded columns in the last k tile.
    diag = jnp.logical_and(i * tq < (j + 1) * tk, j * tk < (i + 1) * tq)
    if n_valid is not None:
        needs_mask = jnp.logical_or(diag, j == nk - 1)
    else:
        needs_mask = diag

    def accumulate(masked):
        if masked:
            rowg = i * tq + lax.broadcasted_iota(jnp.int32, (tq, tk), 0)
            colg = j * tk + lax.broadcasted_iota(jnp.int32, (tq, tk), 1)
            keep = rowg != colg
            if n_valid is not None:
                keep = jnp.logical_and(keep, colg < n_valid)
            lmask = keep.astype(jnp.float32)
        else:
            lmask = None

        def softmax_update(m_s, z_s, s):
            # Running row-max over the *unmasked* row (matches PyTorch's logits_max);
            # it only stabilises exp() and cancels exactly in the final log-prob.
            tile_max = jnp.max(s, axis=1, keepdims=True)
            m_new = jnp.maximum(m_s[...], tile_max)
            e = jnp.exp(s - m_new)
            if lmask is not None:
                e = e * lmask
            z_s[...] = (z_s[...] * jnp.exp(m_s[...] - m_new)
                        + jnp.sum(e, axis=1, keepdims=True))
            m_s[...] = m_new

        def pos_update(pos_raw, p_s, c_s, s):
            pos = pos_raw.astype(jnp.float32)
            if lmask is not None:
                pos = pos * lmask
            # sum(pos * log_prob) = sum(pos * s) - sum(pos) * logZ -> log_prob never built.
            p_s[...] += jnp.sum(pos * s, axis=1, keepdims=True)
            c_s[...] += jnp.sum(pos, axis=1, keepdims=True)

        softmax_update(m1, z1, s1)
        if not shared:                      # only when temp_1 != temp_2
            softmax_update(m2, z2, s2)
        pos_update(pos1_raw, p1, c1, s1)
        pos_update(pos2_raw, p2, c2, s2)

    @pl.when(needs_mask)
    def _masked_tile():
        accumulate(True)

    @pl.when(jnp.logical_not(needs_mask))
    def _fast_tile():
        accumulate(False)

    @pl.when(j == nk - 1)
    def _finalize():
        lse1 = m1[...] + jnp.log(z1[...])
        lse2 = lse1 if shared else (m2[...] + jnp.log(z2[...]))
        # Rows with zero positives and padded rows give 0/0 -> NaN exactly like the
        # PyTorch original; the wrapper slices them off before the mean.
        mlpp1 = p1[...] / c1[...] - lse1
        mlpp2 = p2[...] / c2[...] - lse2
        out_ref[...] = -(coef1 * mlpp1 + coef2 * mlpp2)


def _vmem_capacity_bytes():
    try:
        return int(pltpu.get_tpu_info().vmem_capacity_bytes)
    except Exception:
        return 64 * 1024 * 1024   # conservative fallback: v7x per-TensorCore VMEM


def _vmem_estimate(tq, tk, d, feat_itemsize, shared):
    """Rough per-invocation VMEM footprint (lane/sublane padding included)."""
    n_acc = 6 if shared else 8
    n_tmp = 8 if shared else 10
    feat = 2 * (tq + tk) * d * feat_itemsize     # double-buffered q / k feature tiles
    labels = 2 * (tq * 128 + 8 * tk) * 4         # lane/sublane-padded label tiles (2 bufs)
    temps = n_tmp * tq * tk * 4                  # [tq, tk] f32 temporaries (dots/exp/pos/...)
    scr = n_acc * tq * 128 * 4                   # lane-padded per-row accumulators
    outb = 2 * tq * 128 * 4                      # lane-padded output blocks
    return feat + labels + temps + scr + outb


def multilabel_con_loss(
    features, labels, *,
    temp_1=0.07, temp_base_1=0.07, temp_2=0.07, temp_base_2=0.07,
    weight_1=1.0, weight_2=1.0,
    block_q=512, block_k=1024, matmul_dtype=None,
):
    """features: [bsz, n_views, ...] float; labels: [bsz, 2] int. Returns scalar f32."""
    bsz, n_views = features.shape[0], features.shape[1]
    feat = features.reshape(bsz, n_views, -1).astype(jnp.float32)
    d = feat.shape[-1]
    n = n_views * bsz

    # contrast_feature = torch.cat(torch.unbind(features, dim=1), dim=0): view-major [N, D]
    contrast = jnp.transpose(feat, (1, 0, 2)).reshape(n, d)
    labels_tiled = jnp.tile(labels.astype(jnp.int32), (n_views, 1))       # [N, 2]

    shared = float(temp_1) == float(temp_2)
    if matmul_dtype is not None:
        # bf16 MXU fast path (f32 accumulation). Recommended on v5e / large d: halves
        # the dominant feature-streaming HBM traffic on the lowest-bandwidth generation.
        contrast = contrast.astype(matmul_dtype)
    itm = jnp.dtype(contrast.dtype).itemsize

    # ---- tile selection / padding (VMEM budget re-derived per generation) --------
    cap = _vmem_capacity_bytes()            # 64 MiB/TC on v7x, 128 MiB on v5e/v6e
    budget = int(0.55 * cap)

    if n <= block_q:
        tq = tk = n                 # single tile, no padding (block == full array)
        n_pad = n
    else:
        tq, tk = block_q, block_k
        # Shrink the k tile first, then the q tile, until the estimate fits the
        # per-generation budget (keeps tk at 256-512 on v7x for large d while
        # allowing the full tq=512/tk=1024 tiles on 128 MiB parts).
        while _vmem_estimate(tq, tk, d, itm, shared) > budget and tk > 256:
            tk //= 2
        while _vmem_estimate(tq, tk, d, itm, shared) > budget and tq > 128:
            tq //= 2
        step = (tq * tk) // math.gcd(tq, tk)
        n_pad = int(pl.cdiv(n, step)) * step
        # With the default tq=512/tk=1024, n_pad is a multiple of 1024 so the
        # "parallel" q grid (n_pad/tq) is even -> balanced across v7x's 2 TensorCores.

    if n_pad != n:
        contrast = jnp.pad(contrast, ((0, n_pad - n), (0, 0)))
        labels_tiled = jnp.pad(labels_tiled, ((0, n_pad - n), (0, 0)),
                               constant_values=-1)

    labels_row = labels_tiled.T            # [2, N_pad] — tiny O(N) copy only

    grid = (n_pad // tq, n_pad // tk)

    kernel = functools.partial(
        _multilabel_con_loss_kernel,
        inv_t1=float(1.0 / temp_1), inv_t2=float(1.0 / temp_2),
        coef1=float(weight_1) * float(temp_1) / float(temp_base_1),
        coef2=float(weight_2) * float(temp_2) / float(temp_base_2),
        shared=shared,
        n_valid=(n if n_pad != n else None),
    )

    num_scratch = 6 if shared else 8
    scratch_shapes = [pltpu.VMEM((tq, 1), jnp.float32) for _ in range(num_scratch)]

    est = _vmem_estimate(tq, tk, d, itm, shared)
    vmem_limit = int(min(int(0.7 * cap), max(2 * est, 32 * 1024 * 1024)))

    out = pl.pallas_call(
        kernel,
        out_shape=jax.ShapeDtypeStruct((n_pad, 1), jnp.float32),
        grid=grid,
        in_specs=[
            pl.BlockSpec((tq, 2), lambda i, j: (i, 0)),   # anchor-row labels
            pl.BlockSpec((2, tk), lambda i, j: (0, j)),   # contrast-col labels
            pl.BlockSpec((tq, d), lambda i, j: (i, 0)),   # anchor tile
            pl.BlockSpec((tk, d), lambda i, j: (j, 0)),   # contrast tile (same HBM buffer)
        ],
        out_specs=pl.BlockSpec((tq, 1), lambda i, j: (i, 0)),
        scratch_shapes=scratch_shapes,
        compiler_params=pltpu.CompilerParams(
            dimension_semantics=("parallel", "arbitrary"),
            vmem_limit_bytes=vmem_limit,
        ),
    )(labels_tiled, labels_row, contrast, contrast)

    # loss.view(anchor_count, batch_size).mean() == mean over all N valid rows.
    # (The [:n] slice also drops padded rows, which are NaN by construction.)
    return jnp.mean(out[:n, 0])


def _reference_multilabel_con_loss(
    features, labels, *, temp_1=0.07, temp_base_1=0.07, temp_2=0.07,
    temp_base_2=0.07, weight_1=1.0, weight_2=1.0,
):
    """Pure-JAX reference matching the PyTorch semantics (contrast_mode='all')."""
    bsz, n_views = features.shape[0], features.shape[1]
    feat = features.reshape(bsz, n_views, -1).astype(jnp.float32)
    n = n_views * bsz
    contrast = jnp.transpose(feat, (1, 0, 2)).reshape(n, -1)

    def con_loss(lab, temp, base_temp):
        lab_t = jnp.tile(lab.astype(jnp.int32), (n_views,))
        mask = (lab_t[:, None] == lab_t[None, :]).astype(jnp.float32)
        adc = jnp.dot(contrast, contrast.T, precision=lax.Precision.HIGHEST) / temp
        logits = adc - jnp.max(adc, axis=1, keepdims=True)
        logits_mask = 1.0 - jnp.eye(n, dtype=jnp.float32)
        mask = mask * logits_mask
        exp_logits = jnp.exp(logits) * logits_mask
        log_prob = logits - jnp.log(jnp.sum(exp_logits, axis=1, keepdims=True))
        mlpp = jnp.sum(mask * log_prob, axis=1) / jnp.sum(mask, axis=1)
        return jnp.mean(-(temp / base_temp) * mlpp)

    return (weight_1 * con_loss(labels[:, 0], temp_1, temp_base_1)
            + weight_2 * con_loss(labels[:, 1], temp_2, temp_base_2))


if __name__ == "__main__":
    key = jax.random.PRNGKey(0)
    (k_feat, k_lab1, k_lab2, k_feat2, k_lab3, k_lab4,
     k_feat3, k_lab5, k_lab6) = jax.random.split(key, 9)

    # Small shape consistent with MultiLabelLoss: features [bsz, n_views, dim], labels [bsz, 2].
    bsz, n_views, dim = 8, 2, 32
    features = jax.random.normal(k_feat, (bsz, n_views, dim), dtype=jnp.float32)
    # SupCon-style losses expect ~L2-normalised projection features; unnormalised
    # features make exp() underflow (-> inf loss) in the PyTorch original as well.
    features = features / jnp.linalg.norm(features, axis=-1, keepdims=True)
    labels = jnp.stack(
        [jax.random.randint(k_lab1, (bsz,), 0, 3),
         jax.random.randint(k_lab2, (bsz,), 0, 2)],
        axis=1).astype(jnp.int32)

    # 1) default params (shared-temperature fast path), f32 matmul, single tile.
    loss = jax.block_until_ready(multilabel_con_loss(features, labels))
    ref = jax.block_until_ready(_reference_multilabel_con_loss(features, labels))
    assert jnp.isfinite(loss), ("non-finite loss", loss)
    assert jnp.allclose(loss, ref, atol=2e-2, rtol=2e-2), (loss, ref)

    # 2) distinct temperatures / weights (exercises the non-shared path).
    kw = dict(temp_1=0.1, temp_base_1=0.07, temp_2=0.05, temp_base_2=0.05,
              weight_1=0.7, weight_2=1.3)
    loss2 = jax.block_until_ready(multilabel_con_loss(features, labels, **kw))
    ref2 = jax.block_until_ready(_reference_multilabel_con_loss(features, labels, **kw))
    assert jnp.isfinite(loss2), ("non-finite loss", loss2)
    assert jnp.allclose(loss2, ref2, atol=2e-2, rtol=2e-2), (loss2, ref2)

    # 3) bf16 MXU fast path (f32 accumulation), looser tolerance.
    loss3 = jax.block_until_ready(
        multilabel_con_loss(features, labels, matmul_dtype=jnp.bfloat16))
    assert jnp.isfinite(loss3), ("non-finite loss", loss3)
    assert jnp.allclose(loss3, ref, atol=6e-2, rtol=6e-2), (loss3, ref)

    # 4) multi-tile + padding path: N = 144 padded to 256, grid (2, 2).
    #    Exercises both the masked (diagonal / last padded tile) and unmasked
    #    interior-tile code paths.
    bszL = 72
    featL = jax.random.normal(k_feat2, (bszL, n_views, dim), dtype=jnp.float32)
    featL = featL / jnp.linalg.norm(featL, axis=-1, keepdims=True)
    labL = jnp.stack(
        [jax.random.randint(k_lab3, (bszL,), 0, 5),
         jax.random.randint(k_lab4, (bszL,), 0, 3)],
        axis=1).astype(jnp.int32)
    loss4 = jax.block_until_ready(
        multilabel_con_loss(featL, labL, block_q=128, block_k=128))
    ref4 = jax.block_until_ready(_reference_multilabel_con_loss(featL, labL))
    assert jnp.isfinite(loss4), ("non-finite loss", loss4)
    assert jnp.allclose(loss4, ref4, atol=2e-2, rtol=2e-2), (loss4, ref4)

    # 5) multi-tile, NO padding: N = 256, grid (2, 2) -> off-diagonal tiles take the
    #    fast (unmasked) path with n_valid=None.
    bszM = 128
    featM = jax.random.normal(k_feat3, (bszM, n_views, dim), dtype=jnp.float32)
    featM = featM / jnp.linalg.norm(featM, axis=-1, keepdims=True)
    labM = jnp.stack(
        [jax.random.randint(k_lab5, (bszM,), 0, 5),
         jax.random.randint(k_lab6, (bszM,), 0, 4)],
        axis=1).astype(jnp.int32)
    loss5 = jax.block_until_ready(
        multilabel_con_loss(featM, labM, block_q=128, block_k=128))
    ref5 = jax.block_until_ready(_reference_multilabel_con_loss(featM, labM))
    assert jnp.isfinite(loss5), ("non-finite loss", loss5)
    assert jnp.allclose(loss5, ref5, atol=3e-2, rtol=3e-2), (loss5, ref5)

    print("KERNEL_OK")
</pallas_src>

<mosaic_0001>
module attributes {stable_mosaic.version = 11 : i64} {
  func.func @_multilabel_con_loss_kernel(%arg0: i32, %arg1: i32, %arg2: memref<16x2xi32, #tpu.memory_space<vmem>>, %arg3: memref<2x16xi32, #tpu.memory_space<vmem>>, %arg4: memref<16x32xf32, #tpu.memory_space<vmem>>, %arg5: memref<16x32xf32, #tpu.memory_space<vmem>>, %arg6: memref<16x1xf32, #tpu.memory_space<vmem>>, %arg7: memref<16x1xf32, #tpu.memory_space<vmem>>, %arg8: memref<16x1xf32, #tpu.memory_space<vmem>>, %arg9: memref<16x1xf32, #tpu.memory_space<vmem>>, %arg10: memref<16x1xf32, #tpu.memory_space<vmem>>, %arg11: memref<16x1xf32, #tpu.memory_space<vmem>>, %arg12: memref<16x1xf32, #tpu.memory_space<vmem>>) attributes {dimension_semantics = [#tpu.dimension_semantics<parallel>, #tpu.dimension_semantics<arbitrary>], iteration_bounds = array<i64: 1, 1>, scalar_prefetch = 0 : i64, scratch_operands = 6 : i64, tpu.core_type = #tpu.core_type<tc>, window_params = [{transform_indices = @transform_0, window_bounds = array<i64: 16, 2>}, {transform_indices = @transform_1, window_bounds = array<i64: 2, 16>}, {transform_indices = @transform_2, window_bounds = array<i64: 16, 32>}, {transform_indices = @transform_3, window_bounds = array<i64: 16, 32>}, {transform_indices = @transform_4, window_bounds = array<i64: 16, 1>}]} {
    %c0_i32 = arith.constant 0 : i32
    %0 = arith.cmpi eq, %arg1, %c0_i32 : i32
    %1 = arith.extui %0 : i1 to i32
    %c0_i32_0 = arith.constant 0 : i32
    %2 = arith.cmpi ne, %1, %c0_i32_0 : i32
    scf.if %2 {
      %cst_17 = arith.constant 0xFF800000 : f32
      %37 = vector.broadcast %cst_17 : f32 to vector<16x1xf32>
      %cst_18 = arith.constant 0.000000e+00 : f32
      %38 = vector.broadcast %cst_18 : f32 to vector<16x1xf32>
      %c0_19 = arith.constant 0 : index
      %c0_20 = arith.constant 0 : index
      %39 = vector.load %arg7[%c0_19, %c0_20] : memref<16x1xf32, #tpu.memory_space<vmem>>, vector<16x1xf32>
      tpu.vector_store %arg7[%c0_19, %c0_20], %37 {strides = array<i32>} : memref<16x1xf32, #tpu.memory_space<vmem>>, vector<16x1xf32>,
      %c0_21 = arith.constant 0 : index
      %c0_22 = arith.constant 0 : index
      %40 = vector.load %arg8[%c0_21, %c0_22] : memref<16x1xf32, #tpu.memory_space<vmem>>, vector<16x1xf32>
      tpu.vector_store %arg8[%c0_21, %c0_22], %38 {strides = array<i32>} : memref<16x1xf32, #tpu.memory_space<vmem>>, vector<16x1xf32>,
      %c0_23 = arith.constant 0 : index
      %c0_24 = arith.constant 0 : index
      %41 = vector.load %arg9[%c0_23, %c0_24] : memref<16x1xf32, #tpu.memory_space<vmem>>, vector<16x1xf32>
      tpu.vector_store %arg9[%c0_23, %c0_24], %38 {strides = array<i32>} : memref<16x1xf32, #tpu.memory_space<vmem>>, vector<16x1xf32>,
      %c0_25 = arith.constant 0 : index
      %c0_26 = arith.constant 0 : index
      %42 = vector.load %arg10[%c0_25, %c0_26] : memref<16x1xf32, #tpu.memory_space<vmem>>, vector<16x1xf32>
      tpu.vector_store %arg10[%c0_25, %c0_26], %38 {strides = array<i32>} : memref<16x1xf32, #tpu.memory_space<vmem>>, vector<16x1xf32>,
      %c0_27 = arith.constant 0 : index
      %c0_28 = arith.constant 0 : index
      %43 = vector.load %arg11[%c0_27, %c0_28] : memref<16x1xf32, #tpu.memory_space<vmem>>, vector<16x1xf32>
      tpu.vector_store %arg11[%c0_27, %c0_28], %38 {strides = array<i32>} : memref<16x1xf32, #tpu.memory_space<vmem>>, vector<16x1xf32>,
      %c0_29 = arith.constant 0 : index
      %c0_30 = arith.constant 0 : index
      %44 = vector.load %arg12[%c0_29, %c0_30] : memref<16x1xf32, #tpu.memory_space<vmem>>, vector<16x1xf32>
      tpu.vector_store %arg12[%c0_29, %c0_30], %38 {strides = array<i32>} : memref<16x1xf32, #tpu.memory_space<vmem>>, vector<16x1xf32>,
    } else {
    }
    %c0 = arith.constant 0 : index
    %c0_1 = arith.constant 0 : index
    %3 = vector.load %arg4[%c0, %c0_1] : memref<16x32xf32, #tpu.memory_space<vmem>>, vector<16x32xf32>
    %c0_2 = arith.constant 0 : index
    %c0_3 = arith.constant 0 : index
    %4 = vector.load %arg5[%c0_2, %c0_3] : memref<16x32xf32, #tpu.memory_space<vmem>>, vector<16x32xf32>
    %cst = arith.constant dense<0.000000e+00> : vector<16x16xf32>
    %5 = tpu.matmul %3, %4, %cst {dimension_numbers = #tpu.dot_dimension_numbers<[1], [1], [0], [0], [0, 0, 1, 0], [], []>} : vector<16x32xf32>, vector<16x32xf32>, vector<16x16xf32> -> vector<16x16xf32>
    %cst_4 = arith.constant 14.2857141 : f32
    %6 = vector.broadcast %cst_4 : f32 to vector<16x16xf32>
    %7 = arith.mulf %5, %6 : vector<16x16xf32>
    %c0_5 = arith.constant 0 : index
    %c0_6 = arith.constant 0 : index
    %8 = vector.load %arg2[%c0_5, %c0_6] : memref<16x2xi32, #tpu.memory_space<vmem>>, vector<16x2xi32>
    %c0_7 = arith.constant 0 : index
    %c0_8 = arith.constant 0 : index
    %9 = vector.load %arg3[%c0_7, %c0_8] : memref<2x16xi32, #tpu.memory_space<vmem>>, vector<2x16xi32>
    %10 = vector.extract_strided_slice %8 {offsets = [0, 0], sizes = [16, 1], strides = [1, 1]} : vector<16x2xi32> to vector<16x1xi32>
    %11 = vector.extract_strided_slice %9 {offsets = [0, 0], sizes = [1, 16], strides = [1, 1]} : vector<2x16xi32> to vector<1x16xi32>
    %12 = vector.broadcast %10 : vector<16x1xi32> to vector<16x16xi32>
    %13 = vector.broadcast %11 : vector<1x16xi32> to vector<16x16xi32>
    %14 = arith.cmpi eq, %12, %13 : vector<16x16xi32>
    %15 = vector.extract_strided_slice %8 {offsets = [0, 1], sizes = [16, 1], strides = [1, 1]} : vector<16x2xi32> to vector<16x1xi32>
    %16 = vector.extract_strided_slice %9 {offsets = [1, 0], sizes = [1, 16], strides = [1, 1]} : vector<2x16xi32> to vector<1x16xi32>
    %17 = vector.broadcast %15 : vector<16x1xi32> to vector<16x16xi32>
    %18 = vector.broadcast %16 : vector<1x16xi32> to vector<16x16xi32>
    %19 = arith.cmpi eq, %17, %18 : vector<16x16xi32>
    %c16_i32 = arith.constant 16 : i32
    %20 = arith.muli %arg0, %c16_i32 : i32
    %c1_i32 = arith.constant 1 : i32
    %21 = arith.addi %arg1, %c1_i32 : i32
    %c16_i32_9 = arith.constant 16 : i32
    %22 = arith.muli %21, %c16_i32_9 : i32
    %23 = arith.cmpi slt, %20, %22 : i32
    %c16_i32_10 = arith.constant 16 : i32
    %24 = arith.muli %arg1, %c16_i32_10 : i32
    %c1_i32_11 = arith.constant 1 : i32
    %25 = arith.addi %arg0, %c1_i32_11 : i32
    %c16_i32_12 = arith.constant 16 : i32
    %26 = arith.muli %25, %c16_i32_12 : i32
    %27 = arith.cmpi slt, %24, %26 : i32
    %28 = arith.andi %23, %27 : i1
    %29 = arith.extui %28 : i1 to i32
    %c0_i32_13 = arith.constant 0 : i32
    %30 = arith.cmpi ne, %29, %c0_i32_13 : i32
    scf.if %30 {
      %c16_i32_17 = arith.constant 16 : i32
      %37 = arith.muli %arg0, %c16_i32_17 : i32
      %38 = tpu.iota {dimensions = array<i32: 0>} : vector<16x16xi32>
      %39 = vector.broadcast %37 : i32 to vector<16x16xi32>
      %40 = arith.addi %39, %38 : vector<16x16xi32>
      %c16_i32_18 = arith.constant 16 : i32
      %41 = arith.muli %arg1, %c16_i32_18 : i32
      %42 = tpu.iota {dimensions = array<i32: 1>} : vector<16x16xi32>
      %43 = vector.broadcast %41 : i32 to vector<16x16xi32>
      %44 = arith.addi %43, %42 : vector<16x16xi32>
      %45 = arith.cmpi ne, %40, %44 : vector<16x16xi32>
      %46 = arith.extui %45 : vector<16x16xi1> to vector<16x16xi32>
      %47 = arith.sitofp %46 : vector<16x16xi32> to vector<16x16xf32>
      %cst_19 = arith.constant dense<0xFF800000> : vector<16xf32>
      %48 = vector.multi_reduction <maximumf>, %7, %cst_19 [1] : vector<16x16xf32> to vector<16xf32>
      %49 = vector.shape_cast %48 : vector<16xf32> to vector<16x1xf32>
      %c0_20 = arith.constant 0 : index
      %c0_21 = arith.constant 0 : index
      %50 = vector.load %arg7[%c0_20, %c0_21] : memref<16x1xf32, #tpu.memory_space<vmem>>, vector<16x1xf32>
      %51 = arith.maximumf %50, %49 : vector<16x1xf32>
      %52 = vector.broadcast %51 : vector<16x1xf32> to vector<16x16xf32>
      %53 = arith.subf %7, %52 : vector<16x16xf32>
      %54 = math.exp %53 : vector<16x16xf32>
      %55 = arith.mulf %54, %47 : vector<16x16xf32>
      %c0_22 = arith.constant 0 : index
      %c0_23 = arith.constant 0 : index
      %56 = vector.load %arg8[%c0_22, %c0_23] : memref<16x1xf32, #tpu.memory_space<vmem>>, vector<16x1xf32>
      %c0_24 = arith.constant 0 : index
      %c0_25 = arith.constant 0 : index
      %57 = vector.load %arg7[%c0_24, %c0_25] : memref<16x1xf32, #tpu.memory_space<vmem>>, vector<16x1xf32>
      %58 = arith.subf %57, %51 : vector<16x1xf32>
      %59 = math.exp %58 : vector<16x1xf32>
      %60 = arith.mulf %56, %59 : vector<16x1xf32>
      %cst_26 = arith.constant dense<0.000000e+00> : vector<16xf32>
      %61 = vector.multi_reduction <add>, %55, %cst_26 [1] : vector<16x16xf32> to vector<16xf32>
      %62 = vector.shape_cast %61 : vector<16xf32> to vector<16x1xf32>
      %63 = arith.addf %60, %62 : vector<16x1xf32>
      %c0_27 = arith.constant 0 : index
      %c0_28 = arith.constant 0 : index
      %64 = vector.load %arg8[%c0_27, %c0_28] : memref<16x1xf32, #tpu.memory_space<vmem>>, vector<16x1xf32>
      tpu.vector_store %arg8[%c0_27, %c0_28], %63 {strides = array<i32>} : memref<16x1xf32, #tpu.memory_space<vmem>>, vector<16x1xf32>,
      %c0_29 = arith.constant 0 : index
      %c0_30 = arith.constant 0 : index
      %65 = vector.load %arg7[%c0_29, %c0_30] : memref<16x1xf32, #tpu.memory_space<vmem>>, vector<16x1xf32>
      tpu.vector_store %arg7[%c0_29, %c0_30], %51 {strides = array<i32>} : memref<16x1xf32, #tpu.memory_space<vmem>>, vector<16x1xf32>,
      %66 = arith.extui %14 : vector<16x16xi1> to vector<16x16xi32>
      %67 = arith.sitofp %66 : vector<16x16xi32> to vector<16x16xf32>
      %68 = arith.mulf %67, %47 : vector<16x16xf32>
      %c0_31 = arith.constant 0 : index
      %c0_32 = arith.constant 0 : index
      %69 = vector.load %arg9[%c0_31, %c0_32] : memref<16x1xf32, #tpu.memory_space<vmem>>, vector<16x1xf32>
      %70 = arith.mulf %68, %7 : vector<16x16xf32>
      %cst_33 = arith.constant dense<0.000000e+00> : vector<16xf32>
      %71 = vector.multi_reduction <add>, %70, %cst_33 [1] : vector<16x16xf32> to vector<16xf32>
      %72 = vector.shape_cast %71 : vector<16xf32> to vector<16x1xf32>
      %73 = arith.addf %69, %72 : vector<16x1xf32>
      %c0_34 = arith.constant 0 : index
      %c0_35 = arith.constant 0 : index
      %74 = vector.load %arg9[%c0_34, %c0_35] : memref<16x1xf32, #tpu.memory_space<vmem>>, vector<16x1xf32>
      tpu.vector_store %arg9[%c0_34, %c0_35], %73 {strides = array<i32>} : memref<16x1xf32, #tpu.memory_space<vmem>>, vector<16x1xf32>,
      %c0_36 = arith.constant 0 : index
      %c0_37 = arith.constant 0 : index
      %75 = vector.load %arg10[%c0_36, %c0_37] : memref<16x1xf32, #tpu.memory_space<vmem>>, vector<16x1xf32>
      %cst_38 = arith.constant dense<0.000000e+00> : vector<16xf32>
      %76 = vector.multi_reduction <add>, %68, %cst_38 [1] : vector<16x16xf32> to vector<16xf32>
      %77 = vector.shape_cast %76 : vector<16xf32> to vector<16x1xf32>
      %78 = arith.addf %75, %77 : vector<16x1xf32>
      %c0_39 = arith.constant 0 : index
      %c0_40 = arith.constant 0 : index
      %79 = vector.load %arg10[%c0_39, %c0_40] : memref<16x1xf32, #tpu.memory_space<vmem>>, vector<16x1xf32>
      tpu.vector_store %arg10[%c0_39, %c0_40], %78 {strides = array<i32>} : memref<16x1xf32, #tpu.memory_space<vmem>>, vector<16x1xf32>,
      %80 = arith.extui %19 : vector<16x16xi1> to vector<16x16xi32>
      %81 = arith.sitofp %80 : vector<16x16xi32> to vector<16x16xf32>
      %82 = arith.mulf %81, %47 : vector<16x16xf32>
      %c0_41 = arith.constant 0 : index
      %c0_42 = arith.constant 0 : index
      %83 = vector.load %arg11[%c0_41, %c0_42] : memref<16x1xf32, #tpu.memory_space<vmem>>, vector<16x1xf32>
      %84 = arith.mulf %82, %7 : vector<16x16xf32>
      %cst_43 = arith.constant dense<0.000000e+00> : vector<16xf32>
      %85 = vector.multi_reduction <add>, %84, %cst_43 [1] : vector<16x16xf32> to vector<16xf32>
      %86 = vector.shape_cast %85 : vector<16xf32> to vector<16x1xf32>
      %87 = arith.addf %83, %86 : vector<16x1xf32>
      %c0_44 = arith.constant 0 : index
      %c0_45 = arith.constant 0 : index
      %88 = vector.load %arg11[%c0_44, %c0_45] : memref<16x1xf32, #tpu.memory_space<vmem>>, vector<16x1xf32>
      tpu.vector_store %arg11[%c0_44, %c0_45], %87 {strides = array<i32>} : memref<16x1xf32, #tpu.memory_space<vmem>>, vector<16x1xf32>,
      %c0_46 = arith.constant 0 : index
      %c0_47 = arith.constant 0 : index
      %89 = vector.load %arg12[%c0_46, %c0_47] : memref<16x1xf32, #tpu.memory_space<vmem>>, vector<16x1xf32>
      %cst_48 = arith.constant dense<0.000000e+00> : vector<16xf32>
      %90 = vector.multi_reduction <add>, %82, %cst_48 [1] : vector<16x16xf32> to vector<16xf32>
      %91 = vector.shape_cast %90 : vector<16xf32> to vector<16x1xf32>
      %92 = arith.addf %89, %91 : vector<16x1xf32>
      %c0_49 = arith.constant 0 : index
      %c0_50 = arith.constant 0 : index
      %93 = vector.load %arg12[%c0_49, %c0_50] : memref<16x1xf32, #tpu.memory_space<vmem>>, vector<16x1xf32>
      tpu.vector_store %arg12[%c0_49, %c0_50], %92 {strides = array<i32>} : memref<16x1xf32, #tpu.memory_space<vmem>>, vector<16x1xf32>,
    } else {
    }
    %true = arith.constant true
    %31 = arith.xori %28, %true : i1
    %32 = arith.extui %31 : i1 to i32
    %c0_i32_14 = arith.constant 0 : i32
    %33 = arith.cmpi ne, %32, %c0_i32_14 : i32
    scf.if %33 {
      %cst_17 = arith.constant dense<0xFF800000> : vector<16xf32>
      %37 = vector.multi_reduction <maximumf>, %7, %cst_17 [1] : vector<16x16xf32> to vector<16xf32>
      %38 = vector.shape_cast %37 : vector<16xf32> to vector<16x1xf32>
      %c0_18 = arith.constant 0 : index
      %c0_19 = arith.constant 0 : index
      %39 = vector.load %arg7[%c0_18, %c0_19] : memref<16x1xf32, #tpu.memory_space<vmem>>, vector<16x1xf32>
      %40 = arith.maximumf %39, %38 : vector<16x1xf32>
      %41 = vector.broadcast %40 : vector<16x1xf32> to vector<16x16xf32>
      %42 = arith.subf %7, %41 : vector<16x16xf32>
      %43 = math.exp %42 : vector<16x16xf32>
      %c0_20 = arith.constant 0 : index
      %c0_21 = arith.constant 0 : index
      %44 = vector.load %arg8[%c0_20, %c0_21] : memref<16x1xf32, #tpu.memory_space<vmem>>, vector<16x1xf32>
      %c0_22 = arith.constant 0 : index
      %c0_23 = arith.constant 0 : index
      %45 = vector.load %arg7[%c0_22, %c0_23] : memref<16x1xf32, #tpu.memory_space<vmem>>, vector<16x1xf32>
      %46 = arith.subf %45, %40 : vector<16x1xf32>
      %47 = math.exp %46 : vector<16x1xf32>
      %48 = arith.mulf %44, %47 : vector<16x1xf32>
      %cst_24 = arith.constant dense<0.000000e+00> : vector<16xf32>
      %49 = vector.multi_reduction <add>, %43, %cst_24 [1] : vector<16x16xf32> to vector<16xf32>
      %50 = vector.shape_cast %49 : vector<16xf32> to vector<16x1xf32>
      %51 = arith.addf %48, %50 : vector<16x1xf32>
      %c0_25 = arith.constant 0 : index
      %c0_26 = arith.constant 0 : index
      %52 = vector.load %arg8[%c0_25, %c0_26] : memref<16x1xf32, #tpu.memory_space<vmem>>, vector<16x1xf32>
      tpu.vector_store %arg8[%c0_25, %c0_26], %51 {strides = array<i32>} : memref<16x1xf32, #tpu.memory_space<vmem>>, vector<16x1xf32>,
      %c0_27 = arith.constant 0 : index
      %c0_28 = arith.constant 0 : index
      %53 = vector.load %arg7[%c0_27, %c0_28] : memref<16x1xf32, #tpu.memory_space<vmem>>, vector<16x1xf32>
      tpu.vector_store %arg7[%c0_27, %c0_28], %40 {strides = array<i32>} : memref<16x1xf32, #tpu.memory_space<vmem>>, vector<16x1xf32>,
      %54 = arith.extui %14 : vector<16x16xi1> to vector<16x16xi32>
      %55 = arith.sitofp %54 : vector<16x16xi32> to vector<16x16xf32>
      %c0_29 = arith.constant 0 : index
      %c0_30 = arith.constant 0 : index
      %56 = vector.load %arg9[%c0_29, %c0_30] : memref<16x1xf32, #tpu.memory_space<vmem>>, vector<16x1xf32>
      %57 = arith.mulf %55, %7 : vector<16x16xf32>
      %cst_31 = arith.constant dense<0.000000e+00> : vector<16xf32>
      %58 = vector.multi_reduction <add>, %57, %cst_31 [1] : vector<16x16xf32> to vector<16xf32>
      %59 = vector.shape_cast %58 : vector<16xf32> to vector<16x1xf32>
      %60 = arith.addf %56, %59 : vector<16x1xf32>
      %c0_32 = arith.constant 0 : index
      %c0_33 = arith.constant 0 : index
      %61 = vector.load %arg9[%c0_32, %c0_33] : memref<16x1xf32, #tpu.memory_space<vmem>>, vector<16x1xf32>
      tpu.vector_store %arg9[%c0_32, %c0_33], %60 {strides = array<i32>} : memref<16x1xf32, #tpu.memory_space<vmem>>, vector<16x1xf32>,
      %c0_34 = arith.constant 0 : index
      %c0_35 = arith.constant 0 : index
      %62 = vector.load %arg10[%c0_34, %c0_35] : memref<16x1xf32, #tpu.memory_space<vmem>>, vector<16x1xf32>
      %cst_36 = arith.constant dense<0.000000e+00> : vector<16xf32>
      %63 = vector.multi_reduction <add>, %55, %cst_36 [1] : vector<16x16xf32> to vector<16xf32>
      %64 = vector.shape_cast %63 : vector<16xf32> to vector<16x1xf32>
      %65 = arith.addf %62, %64 : vector<16x1xf32>
      %c0_37 = arith.constant 0 : index
      %c0_38 = arith.constant 0 : index
      %66 = vector.load %arg10[%c0_37, %c0_38] : memref<16x1xf32, #tpu.memory_space<vmem>>, vector<16x1xf32>
      tpu.vector_store %arg10[%c0_37, %c0_38], %65 {strides = array<i32>} : memref<16x1xf32, #tpu.memory_space<vmem>>, vector<16x1xf32>,
      %67 = arith.extui %19 : vector<16x16xi1> to vector<16x16xi32>
      %68 = arith.sitofp %67 : vector<16x16xi32> to vector<16x16xf32>
      %c0_39 = arith.constant 0 : index
      %c0_40 = arith.constant 0 : index
      %69 = vector.load %arg11[%c0_39, %c0_40] : memref<16x1xf32, #tpu.memory_space<vmem>>, vector<16x1xf32>
      %70 = arith.mulf %68, %7 : vector<16x16xf32>
      %cst_41 = arith.constant dense<0.000000e+00> : vector<16xf32>
      %71 = vector.multi_reduction <add>, %70, %cst_41 [1] : vector<16x16xf32> to vector<16xf32>
      %72 = vector.shape_cast %71 : vector<16xf32> to vector<16x1xf32>
      %73 = arith.addf %69, %72 : vector<16x1xf32>
      %c0_42 = arith.constant 0 : index
      %c0_43 = arith.constant 0 : index
      %74 = vector.load %arg11[%c0_42, %c0_43] : memref<16x1xf32, #tpu.memory_space<vmem>>, vector<16x1xf32>
      tpu.vector_store %arg11[%c0_42, %c0_43], %73 {strides = array<i32>} : memref<16x1xf32, #tpu.memory_space<vmem>>, vector<16x1xf32>,
      %c0_44 = arith.constant 0 : index
      %c0_45 = arith.constant 0 : index
      %75 = vector.load %arg12[%c0_44, %c0_45] : memref<16x1xf32, #tpu.memory_space<vmem>>, vector<16x1xf32>
      %cst_46 = arith.constant dense<0.000000e+00> : vector<16xf32>
      %76 = vector.multi_reduction <add>, %68, %cst_46 [1] : vector<16x16xf32> to vector<16xf32>
      %77 = vector.shape_cast %76 : vector<16xf32> to vector<16x1xf32>
      %78 = arith.addf %75, %77 : vector<16x1xf32>
      %c0_47 = arith.constant 0 : index
      %c0_48 = arith.constant 0 : index
      %79 = vector.load %arg12[%c0_47, %c0_48] : memref<16x1xf32, #tpu.memory_space<vmem>>, vector<16x1xf32>
      tpu.vector_store %arg12[%c0_47, %c0_48], %78 {strides = array<i32>} : memref<16x1xf32, #tpu.memory_space<vmem>>, vector<16x1xf32>,
    } else {
    }
    %c0_i32_15 = arith.constant 0 : i32
    %34 = arith.cmpi eq, %arg1, %c0_i32_15 : i32
    %35 = arith.extui %34 : i1 to i32
    %c0_i32_16 = arith.constant 0 : i32
    %36 = arith.cmpi ne, %35, %c0_i32_16 : i32
    scf.if %36 {
      %c0_17 = arith.constant 0 : index
      %c0_18 = arith.constant 0 : index
      %37 = vector.load %arg7[%c0_17, %c0_18] : memref<16x1xf32, #tpu.memory_space<vmem>>, vector<16x1xf32>
      %c0_19 = arith.constant 0 : index
      %c0_20 = arith.constant 0 : index
      %38 = vector.load %arg8[%c0_19, %c0_20] : memref<16x1xf32, #tpu.memory_space<vmem>>, vector<16x1xf32>
      %39 = math.log %38 : vector<16x1xf32>
      %40 = arith.addf %37, %39 : vector<16x1xf32>
      %c0_21 = arith.constant 0 : index
      %c0_22 = arith.constant 0 : index
      %41 = vector.load %arg9[%c0_21, %c0_22] : memref<16x1xf32, #tpu.memory_space<vmem>>, vector<16x1xf32>
      %c0_23 = arith.constant 0 : index
      %c0_24 = arith.constant 0 : index
      %42 = vector.load %arg10[%c0_23, %c0_24] : memref<16x1xf32, #tpu.memory_space<vmem>>, vector<16x1xf32>
      %43 = arith.divf %41, %42 : vector<16x1xf32>
      %44 = arith.subf %43, %40 : vector<16x1xf32>
      %c0_25 = arith.constant 0 : index
      %c0_26 = arith.constant 0 : index
      %45 = vector.load %arg11[%c0_25, %c0_26] : memref<16x1xf32, #tpu.memory_space<vmem>>, vector<16x1xf32>
      %c0_27 = arith.constant 0 : index
      %c0_28 = arith.constant 0 : index
      %46 = vector.load %arg12[%c0_27, %c0_28] : memref<16x1xf32, #tpu.memory_space<vmem>>, vector<16x1xf32>
      %47 = arith.divf %45, %46 : vector<16x1xf32>
      %48 = arith.subf %47, %40 : vector<16x1xf32>
      %cst_29 = arith.constant 1.000000e+00 : f32
      %49 = vector.broadcast %cst_29 : f32 to vector<16x1xf32>
      %50 = arith.mulf %49, %44 : vector<16x1xf32>
      %cst_30 = arith.constant 1.000000e+00 : f32
      %51 = vector.broadcast %cst_30 : f32 to vector<16x1xf32>
      %52 = arith.mulf %51, %48 : vector<16x1xf32>
      %53 = arith.addf %50, %52 : vector<16x1xf32>
      %cst_31 = arith.constant 0.000000e+00 : f32
      %54 = vector.broadcast %cst_31 : f32 to vector<16x1xf32>
      %55 = arith.subf %54, %53 : vector<16x1xf32>
      %c0_32 = arith.constant 0 : index
      %c0_33 = arith.constant 0 : index
      %56 = vector.load %arg6[%c0_32, %c0_33] : memref<16x1xf32, #tpu.memory_space<vmem>>, vector<16x1xf32>
      tpu.vector_store %arg6[%c0_32, %c0_33], %55 {strides = array<i32>} : memref<16x1xf32, #tpu.memory_space<vmem>>, vector<16x1xf32>,
    } else {
    }
    return
  }
  func.func @transform_0(%arg0: i32, %arg1: i32) -> (i32, i32) {
    %c0_i32 = arith.constant 0 : i32
    %c0_i32_0 = arith.constant 0 : i32
    return %arg0, %c0_i32 : i32, i32
  }
  func.func @transform_1(%arg0: i32, %arg1: i32) -> (i32, i32) {
    %c0_i32 = arith.constant 0 : i32
    %c0_i32_0 = arith.constant 0 : i32
    return %c0_i32, %arg1 : i32, i32
  }
  func.func @transform_2(%arg0: i32, %arg1: i32) -> (i32, i32) {
    %c0_i32 = arith.constant 0 : i32
    %c0_i32_0 = arith.constant 0 : i32
    return %arg0, %c0_i32 : i32, i32
  }
  func.func @transform_3(%arg0: i32, %arg1: i32) -> (i32, i32) {
    %c0_i32 = arith.constant 0 : i32
    %c0_i32_0 = arith.constant 0 : i32
    return %arg1, %c0_i32 : i32, i32
  }
  func.func @transform_4(%arg0: i32, %arg1: i32) -> (i32, i32) {
    %c0_i32 = arith.constant 0 : i32
    %c0_i32_0 = arith.constant 0 : i32
    return %arg0, %c0_i32 : i32, i32
  }
}

</mosaic_0001>

<bundles_post_ra>
// kernel: tpu_custom_call.1
= control target key start
LH: loop header
LB: loop body
LE: loop exit
PB: predicated region body
PF: predicated region fallthrough
CT: control target
= control target key end

     0   :  { %9 = vsyncpa [#allocation9], 0  ;;  %s541_s18 = smov [#allocation8]   ;;  %s542_s20 = smov 128   ;;  %s769_s0 = inlined_call_operand.vmem [shape: s32[16,2], index: 0, kind: input, shape index: {}]   ;;  %s770_s1 = inlined_call_operand.vmem [shape: s32[2,16], index: 1, kind: input, shape index: {}]   ;;  %s771_s2 = inlined_call_operand.vmem [shape: f32[16,32], index: 2, kind: input, shape index: {}]   ;;  %s772_s3 = inlined_call_operand.hbm [shape: f32[16,32], index: 3, kind: input, shape index: {}]   ;;  %s773_s4 = inlined_call_operand.vmem [shape: f32[16,1], index: 4, kind: output, shape index: {}]  }
   0x1   :  { %s20_s17 = sshll.u32 %s772_s3, 4  ;;  %s22_s19 = sshll.u32 %s541_s18, 4  ;;  %s21_s17 = int_to_ptr.hbm [resolvable:$true] %s20_s17  ;;  %s23_s19 = int_to_ptr.vmem [resolvable:$true] %s22_s19 }
   0x2   :  { %s543_s21 = smov 8  }
   0x3   :  { %28 = dma.hbm_to_vmem [thread:$0]  %s21_s17, 256, %s23_s19, [#allocation9], %s542_s20, %s542_s20, %s543_s21  }
   0x4   :  { %539 = dma.done.wait [#allocation9], 256  }
   0x5   :  { %540 = vsyncadd [#allocation9], 4294967040  ;;  %v544_v0 = vmov 0   ;;  %vm54_vm0 = vcmask 261120   ;;  %v53_v1 = vld [vmem:[#allocation8 + $0x8] sm:$0xff]  ;;  %v92_v2 = vld [vmem:[%s769_s0] sm:$0xff]  ;;  %v125_v25 = vlaneseq }
   0x6   :  { %490 = vset.pattern.permute.xlu2 %v544_v0  ;;  %492 = vset.pattern.permute.xlu1 %v544_v0  ;;  %v52_v3 = vld [vmem:[#allocation8] sm:$0xff]  ;;  %v51_v5 = vld [vmem:[%s771_s2 + $0x8] sm:$0xff]  ;;  %v545_v7 = vmov 1   ;;  %vm141_vm1 = vcmask 130048   ;;  %vm37_vm2 = vcmask 7168   ;;  %v546_v10 = vmov -inf  }
   0x7   :  { %467 = vmatpush.xpose.msk.msra.mxu0 %vm54_vm0, %v53_v1  ;;  %481 = vmatpush.xpose.msk.msra.mxu1 %vm54_vm0, %v53_v1  ;;  %v50_v4 = vld [vmem:[%s771_s2] sm:$0xff]  ;;  %v93_v6 = vld [vmem:[%s769_s0 + $0x8] sm:$0xff]  ;;  %38 = vst.msk [vmem:[#allocation2] sm:$0xff] %vm37_vm2, %v546_v10  ;;  %v547_v13 = vmov 0.0   ;;  %v126_v27 = vshrl.u32 %v125_v25, 7  ;;  %v132_v29 = vand.u32 127, %v125_v25 }
   0x8   :  { %96 = vperm.xlu2 %490, %v92_v2   ;;  %491 = vset.pattern.permute.xlu0 %v545_v7  ;;  %39 = vst.msk [vmem:[#allocation2 + $0x8] sm:$0xff] %vm37_vm2, %v546_v10  ;;  %v94_v26 = vld [vmem:[%s770_s1] sm:$0x3] }
   0x9   :  { %40 = vst.msk [vmem:[#allocation3] sm:$0xff] %vm37_vm2, %v547_v13  ;;  %v101_v28 = vperm.slane %v94_v26, 0  ;;  %v127_v30 = vadd.s32 8, %v126_v27  ;;  %vm135_vm5 = vcmp.ne.s32.totalorder %v126_v27, %v132_v29  ;;  %v110_v38 = vperm.slane %v94_v26, 1 }
   0xa   :  { %41 = vst.msk [vmem:[#allocation3 + $0x8] sm:$0xff] %vm37_vm2, %v547_v13  ;;  %v471_v34 = vsel %vm135_vm5, 1.0, %v547_v13 }
   0xb   :  { %468 = vmatpush.xpose.msk.msra.mxu0 %vm54_vm0, %v52_v3  ;;  %482 = vmatpush.xpose.msk.msra.mxu1 %vm54_vm0, %v52_v3  ;;  %42 = vst.msk [vmem:[#allocation4] sm:$0xff] %vm37_vm2, %v547_v13  ;;  %vm136_vm6 = vcmp.ne.s32.totalorder %v127_v30, %v132_v29 }
   0xc   :  { %43 = vst.msk [vmem:[#allocation4 + $0x8] sm:$0xff] %vm37_vm2, %v547_v13  ;;  %v472_v35 = vsel %vm136_vm6, 1.0, %v547_v13 }
   0xd   :  { %44 = vst.msk [vmem:[#allocation5] sm:$0xff] %vm37_vm2, %v547_v13 }
   0xe   :  { %469 = vmatmul.msk.f32.vlgmr.msra.gmra.mxu0 %vm54_vm0, %v50_v4  ;;  %470 = vmatmul.msk.f32.vlgmr.msra.gmra.mxu1 %vm54_vm0, %v51_v5  ;;  %45 = vst.msk [vmem:[#allocation5 + $0x8] sm:$0xff] %vm37_vm2, %v547_v13  ;;  %v618_v16 = vld [vmem:[#allocation2] sm:$0xff] }
   0xf   :  { %46 = vst.msk [vmem:[#allocation6] sm:$0xff] %vm37_vm2, %v547_v13  ;;  %v628_v20 = vld [vmem:[#allocation2 + $0x8] sm:$0xff] }
  0x10   :  { %99 = vperm.xlu2 %490, %v93_v6   ;;  %47 = vst.msk [vmem:[#allocation6 + $0x8] sm:$0xff] %vm37_vm2, %v547_v13 }
  0x11   :  { %48 = vst.msk [vmem:[#allocation7] sm:$0xff] %vm37_vm2, %v547_v13 }
  0x12   :  { %49 = vst.msk [vmem:[#allocation7 + $0x8] sm:$0xff] %vm37_vm2, %v547_v13 }
  0x14   :  { %v213_v5 = vld [vmem:[#allocation5] sm:$0xff] }
  0x19   :  { %v246_v25 = vld [vmem:[#allocation7 + $0x8] sm:$0xff] }
  0x62   :  { %v97_v24 = vpop.permute.xlu2 %96 }
  0x63   :  { %vm102_vm3 = vcmp.eq.s32.totalorder %v97_v24, %v101_v28  ;;  %v171_v24 = vld [vmem:[#allocation3 + $0x8] sm:$0xff] }
  0x64   :  { %v473_v32 = vsel %vm102_vm3, 1.0, %v547_v13 }
  0x65   :  { %v197_v36 = vmul.f32 %v473_v32, %v471_v34 }
  0x67   :  { %v215_v39 = vsel %vm141_vm1, %v197_v36, 0.0 }
  0x68   :  { %216 = vadd.xlane.f32.xlu2 %v215_v39 }
  0x6a   :  { %v100_v31 = vpop.permute.xlu2 %99 }
  0x6b   :  { %vm103_vm4 = vcmp.eq.s32.totalorder %v100_v31, %v101_v28  ;;  %v200_v31 = vld [vmem:[#allocation4 + $0x8] sm:$0xff] }
  0x6c   :  { %v474_v33 = vsel %vm103_vm4, 1.0, %v547_v13 }
  0x6d   :  { %v198_v37 = vmul.f32 %v474_v33, %v472_v35 }
  0x6f   :  { %v218_v40 = vsel %vm141_vm1, %v198_v37, 0.0 }
  0x8b   :  { %v84_v8 = vpop.f32.mrf.mxu0  ;;  %v87_v11 = vpop.f32.mrf.mxu1 }
  0x8c   :  { %v588_v9 = vmul.f32 14.285714, %v84_v8  ;;  %v598_v14 = vmul.f32 14.285714, %v87_v11 }
  0x8e   :  { %v142_v12 = vsel %vm141_vm1, %v588_v9, -inf  ;;  %v145_v15 = vsel %vm141_vm1, %v598_v14, -inf  ;;  %v202_v59 = vmul.f32 %v198_v37, %v598_v14  ;;  %v201_v63 = vmul.f32 %v197_v36, %v588_v9 }
  0x8f   :  { %143 = vmax.xlane.f32.xlu0 %v142_v12  ;;  %v245_v12 = vld [vmem:[#allocation7] sm:$0xff] }
  0x90   :  { %v206_v61 = vsel %vm141_vm1, %v202_v59, 0.0  ;;  %v203_v1 = vsel %vm141_vm1, %v201_v63, 0.0 }
  0x97   :  { %146 = vmax.xlane.f32.xlu0 %v145_v15 }
  0xab   :  { %105 = vperm.xlu0 %491, %v92_v2  }
  0xb3   :  { %494 = vset.pattern.permute.xlu0 %v544_v0 }
 0x102   :  { %v144_v17 = vpop.xlane.xlu0 %143 }
 0x103   :  { %v621_v18 = vmax.f32 %v618_v16, %v144_v17 }
 0x105   :  { %v172_v19 = vsub.f32 %v618_v16, %v621_v18  ;;  %191 = vst.msk [vmem:[#allocation2] sm:$0xff] %vm37_vm2, %v621_v18  ;;  %154 = vperm.xlu1 %492, %v621_v18   ;;  %v170_v18 = vld [vmem:[#allocation3] sm:$0xff] }
 0x107   :  { %v174_v17 = vmul.f32 1.442695, %v172_v19 }
 0x10a   :  { %v147_v21 = vpop.xlane.xlu0 %146 }
 0x10b   :  { %v631_v22 = vmax.f32 %v628_v20, %v147_v21 }
 0x10d   :  { %v173_v23 = vsub.f32 %v628_v20, %v631_v22  ;;  %192 = vst.msk [vmem:[#allocation2 + $0x8] sm:$0xff] %vm37_vm2, %v631_v22  ;;  %159 = vperm.xlu1 %492, %v631_v22  }
 0x115   :  { %493 = vset.pattern.permute.xlu1 %v545_v7  ;;  %v217_v7 = vpop.xlane.xlu2 %216 }
 0x116   :  { %108 = vperm.xlu1 %493, %v93_v6   ;;  %v214_v6 = vld [vmem:[#allocation5 + $0x8] sm:$0xff]  ;;  %v221_v10 = vadd.f32 %v217_v7, %v213_v5  ;;  %v231_v7 = vld [vmem:[#allocation6] sm:$0xff] }
 0x118   :  { %223 = vst.msk [vmem:[#allocation5] sm:$0xff] %vm37_vm2, %v221_v10 }
 0x11d   :  { %v106_v41 = vpop.permute.xlu0 %105 }
 0x11e   :  { %vm111_vm7 = vcmp.eq.s32.totalorder %v106_v41, %v110_v38 }
 0x11f   :  { %v475_v42 = vsel %vm111_vm7, 1.0, %v547_v13  ;;  %v675_v27 = vld [vmem:[#allocation5] sm:$0xff] }
 0x120   :  { %v229_v43 = vmul.f32 %v475_v42, %v471_v34  ;;  %vm392_vm12 = vweird.f32 %v675_v27 }
 0x122   :  { %v247_v44 = vsel %vm141_vm1, %v229_v43, 0.0  ;;  %v233_v3 = vmul.f32 %v229_v43, %v588_v9 }
 0x123   :  { %248 = vadd.xlane.f32.xlu0 %v247_v44  ;;  %v199_v44 = vld [vmem:[#allocation4] sm:$0xff] }
 0x124   :  { %v235_v4 = vsel %vm141_vm1, %v233_v3, 0.0 }
 0x140   :  { %219 = vadd.xlane.f32.xlu1 %v218_v40 }
 0x177   :  { %v155_v45 = vpop.permute.xlu1 %154 }
 0x178   :  { %v162_v47 = vsub.f32 %v588_v9, %v155_v45  ;;  %v176_v9 = vmul.f32 1.442695, %v173_v23  ;;  %v232_v45 = vld [vmem:[#allocation6 + $0x8] sm:$0xff] }
 0x17a   :  { %v164_v50 = vmul.f32 1.442695, %v162_v47 }
 0x17f   :  { %v160_v46 = vpop.permute.xlu1 %159 }
 0x180   :  { %v163_v48 = vsub.f32 %v598_v14, %v160_v46 }
 0x182   :  { %v166_v49 = vmul.f32 1.442695, %v163_v48 }
 0x184   :  { %495 = vpow2.f32 %v166_v49 }
 0x185   :  { %497 = vpow2.f32 %v164_v50 }
 0x186   :  { %499 = vpow2.f32 %v176_v9 }
 0x188   :  { %v109_v51 = vpop.permute.xlu1 %108 }
 0x189   :  { %vm112_vm8 = vcmp.eq.s32.totalorder %v109_v51, %v110_v38 }
 0x18a   :  { %v496_v52 = vpop.eup %495  ;;  %v476_v53 = vsel %vm112_vm8, 1.0, %v547_v13 }
 0x18b   :  { %v169_v54 = vmul.f32 %v496_v52, %v472_v35  ;;  %v230_v55 = vmul.f32 %v476_v53, %v472_v35  ;;  %v498_v58 = vpop.eup %497 }
 0x18c   :  { %v168_v60 = vmul.f32 %v498_v58, %v471_v34  ;;  %v500_v21 = vpop.eup %499 }
 0x18d   :  { %v183_v56 = vsel %vm141_vm1, %v169_v54, 0.0  ;;  %v250_v57 = vsel %vm141_vm1, %v230_v55, 0.0  ;;  %v234_v0 = vmul.f32 %v230_v55, %v598_v14  ;;  %v179_v26 = vmul.f32 %v500_v21, %v171_v24 }
 0x18e   :  { %184 = vadd.xlane.f32.xlu1 %v183_v56  ;;  %251 = vadd.xlane.f32.xlu2 %v250_v57  ;;  %v180_v62 = vsel %vm141_vm1, %v168_v60, 0.0 }
 0x18f   :  { %v238_v2 = vsel %vm141_vm1, %v234_v0, 0.0 }
 0x196   :  { %207 = vadd.xlane.f32.xlu1 %v206_v61  ;;  %181 = vadd.xlane.f32.xlu2 %v180_v62  ;;  %v249_v13 = vpop.xlane.xlu0 %248  ;;  %v398_v62 = vand.u32 2147483648, %v675_v27 }
 0x197   :  { %v253_v14 = vadd.f32 %v249_v13, %v245_v12  ;;  %v396_v13 = vand.u32 2147483647, %v675_v27 }
 0x199   :  { %255 = vst.msk [vmem:[#allocation7] sm:$0xff] %vm37_vm2, %v253_v14  ;;  %vm397_vm8 = vcmp.eq.f32.partialorder %v396_v13, 8.507059e+37 }
 0x19e   :  { %204 = vadd.xlane.f32.xlu2 %v203_v1  ;;  %239 = vadd.xlane.f32.xlu1 %v238_v2 }
 0x1a0   :  { %v680_v30 = vld [vmem:[#allocation7] sm:$0xff] }
 0x1a1   :  { %vm428_vm15 = vweird.f32 %v680_v30  ;;  %v434_v10 = vand.u32 2147483648, %v680_v30 }
 0x1a6   :  { %236 = vadd.xlane.f32.xlu2 %v235_v4 }
 0x1b3   :  { %v220_v8 = vpop.xlane.xlu1 %219 }
 0x1b4   :  { %v222_v11 = vadd.f32 %v220_v8, %v214_v6 }
 0x1b6   :  { %224 = vst.msk [vmem:[#allocation5 + $0x8] sm:$0xff] %vm37_vm2, %v222_v11 }
 0x1bd   :  { %v669_v15 = vld [vmem:[#allocation5 + $0x8] sm:$0xff] }
 0x1be   :  { %501 = vrcp.f32 %v669_v15  ;;  %vm407_vm9 = vweird.f32 %v669_v15  ;;  %v413_v48 = vand.u32 2147483648, %v669_v15  ;;  %v411_v53 = vand.u32 2147483647, %v669_v15 }
 0x1bf   :  { %503 = vpow2.f32 %v174_v17 }
 0x1c0   :  { %505 = vrcp.f32 %v675_v27  ;;  %vm720_vm13 = vcmp.eq.f32.partialorder %v411_v53, 8.507059e+37  ;;  %v414_v3 = vor.u32 1.1754944e-38, %v413_v48 }
 0x1c1   :  { %507 = vrcp.f32 %v680_v30 }
 0x1c4   :  { %v677_v23 = vpop.eup %501 }
 0x1c5   :  { %v504_v16 = vpop.eup %503  ;;  %v403_v19 = vmul.f32 %v677_v23, %v669_v15  ;;  %vm408_vm10 = vweird.f32 %v677_v23  ;;  %v374_v15 = vld [vmem:[#allocation2 + $0x8] sm:$0xff] }
 0x1c6   :  { %v178_v32 = vmul.f32 %v504_v16, %v170_v18  ;;  %v687_v35 = vpop.eup %505  ;;  %vm707_vm11 = vmor %vm407_vm9, %vm408_vm10  ;;  %v432_v18 = vand.u32 2147483647, %v680_v30 }
 0x1c7   :  { %v404_v36 = vsub.f32 1.0, %v403_v19  ;;  %v693_v41 = vpop.eup %507  ;;  %v388_v42 = vmul.f32 %v687_v35, %v675_v27  ;;  %vm393_vm0 = vweird.f32 %v687_v35  ;;  %v399_v19 = vor.u32 1.1754944e-38, %v398_v62 }
 0x1c8   :  { %v424_v46 = vmul.f32 %v693_v41, %v680_v30  ;;  %vm429_vm4 = vweird.f32 %v693_v41  ;;  %vm740_vm5 = vmor %vm392_vm12, %vm393_vm0  ;;  %vm433_vm9 = vcmp.eq.f32.partialorder %v432_v18, 8.507059e+37  ;;  %v373_v30 = vld [vmem:[#allocation2] sm:$0xff] }
 0x1c9   :  { %v405_v43 = vmul.f32 %v677_v23, %v404_v36  ;;  %v389_v47 = vsub.f32 1.0, %v388_v42  ;;  %vm751_vm7 = vmor %vm428_vm15, %vm429_vm4 }
 0x1ca   :  { %v425_v60 = vsub.f32 1.0, %v424_v46 }
 0x1cb   :  { %v406_v52 = vadd.f32 %v677_v23, %v405_v43  ;;  %v390_v61 = vmul.f32 %v687_v35, %v389_v47 }
 0x1cc   :  { %v426_v8 = vmul.f32 %v693_v41, %v425_v60 }
 0x1cd   :  { %v410_v1 = vsel %vm707_vm11, %v677_v23, %v406_v52  ;;  %v391_v12 = vadd.f32 %v687_v35, %v390_v61 }
 0x1ce   :  { %v415_v17 = vsel %vm720_vm13, %v414_v3, %v410_v1  ;;  %v427_v16 = vadd.f32 %v693_v41, %v426_v8 }
 0x201   :  { %v252_v28 = vpop.xlane.xlu2 %251  ;;  %v185_v29 = vpop.xlane.xlu1 %184 }
 0x202   :  { %v254_v20 = vadd.f32 %v252_v28, %v246_v25  ;;  %v187_v22 = vadd.f32 %v185_v29, %v179_v26 }
 0x204   :  { %256 = vst.msk [vmem:[#allocation7 + $0x8] sm:$0xff] %vm37_vm2, %v254_v20 }
 0x205   :  { %190 = vst.msk [vmem:[#allocation3 + $0x8] sm:$0xff] %vm37_vm2, %v187_v22 }
 0x209   :  { %v182_v33 = vpop.xlane.xlu2 %181  ;;  %v208_v34 = vpop.xlane.xlu1 %207 }
 0x20a   :  { %v186_v37 = vadd.f32 %v182_v33, %v178_v32  ;;  %v210_v38 = vadd.f32 %v208_v34, %v200_v31  ;;  %v395_v33 = vsel %vm740_vm5, %v687_v35, %v391_v12 }
 0x20b   :  { %v689_v39 = vld [vmem:[#allocation7 + $0x8] sm:$0xff] }
 0x20c   :  { %509 = vrcp.f32 %v689_v39  ;;  %v376_v40 = vld [vmem:[#allocation3 + $0x8] sm:$0xff]  ;;  %189 = vst.msk [vmem:[#allocation3] sm:$0xff] %vm37_vm2, %v186_v37  ;;  %v449_v0 = vand.u32 2147483648, %v689_v39  ;;  %v447_v6 = vand.u32 2147483647, %v689_v39  ;;  %vm443_vm1 = vweird.f32 %v689_v39 }
 0x20d   :  { %212 = vst.msk [vmem:[#allocation4 + $0x8] sm:$0xff] %vm37_vm2, %v210_v38  ;;  %511 = vlog2.f32 %v376_v40  ;;  %v435_v38 = vor.u32 1.1754944e-38, %v434_v10  ;;  %v400_v40 = vsel %vm397_vm8, %v399_v19, %v395_v33 }
 0x20e   :  { %v450_v21 = vor.u32 1.1754944e-38, %v449_v0  ;;  %vm448_vm6 = vcmp.eq.f32.partialorder %v447_v6, 8.507059e+37 }
 0x211   :  { %v205_v49 = vpop.xlane.xlu2 %204  ;;  %v240_v50 = vpop.xlane.xlu1 %239 }
 0x212   :  { %v510_v51 = vpop.eup %509  ;;  %v209_v54 = vadd.f32 %v205_v49, %v199_v44  ;;  %v242_v55 = vadd.f32 %v240_v50, %v232_v45 }
 0x213   :  { %v439_v56 = vmul.f32 %v510_v51, %v689_v39  ;;  %v375_v57 = vld [vmem:[#allocation3] sm:$0xff]  ;;  %v512_v59 = vpop.eup %511  ;;  %vm444_vm14 = vweird.f32 %v510_v51  ;;  %v431_v39 = vsel %vm751_vm7, %v693_v41, %v427_v16 }
 0x214   :  { %211 = vst.msk [vmem:[#allocation4] sm:$0xff] %vm37_vm2, %v209_v54  ;;  %513 = vlog2.f32 %v375_v57  ;;  %v380_v5 = vmul.f32 0.6931472, %v512_v59  ;;  %v384_v11 = vld [vmem:[#allocation4 + $0x8] sm:$0xff]  ;;  %vm445_vm3 = vmor %vm443_vm1, %vm444_vm14  ;;  %v436_v46 = vsel %vm433_vm9, %v435_v38, %v431_v39 }
 0x215   :  { %v440_v63 = vsub.f32 1.0, %v439_v56  ;;  %244 = vst.msk [vmem:[#allocation6 + $0x8] sm:$0xff] %vm37_vm2, %v242_v55  ;;  %v416_v28 = vmul.f32 %v415_v17, %v384_v11 }
 0x216   :  { %v382_v26 = vadd.f32 %v380_v5, %v374_v15 }
 0x217   :  { %v441_v4 = vmul.f32 %v510_v51, %v440_v63 }
 0x218   :  { %v418_v34 = vsub.f32 %v416_v28, %v382_v26 }
 0x219   :  { %v442_v14 = vadd.f32 %v510_v51, %v441_v4  ;;  %v237_v9 = vpop.xlane.xlu2 %236 }
 0x21a   :  { %v241_v24 = vadd.f32 %v237_v9, %v231_v7  ;;  %v514_v25 = vpop.eup %513 }
 0x21b   :  { %v446_v20 = vsel %vm445_vm3, %v510_v51, %v442_v14  ;;  %v378_v32 = vmul.f32 0.6931472, %v514_v25  ;;  %v383_v36 = vld [vmem:[#allocation4] sm:$0xff] }
 0x21c   :  { %v451_v22 = vsel %vm448_vm6, %v450_v21, %v446_v20  ;;  %v420_v23 = vld [vmem:[#allocation6 + $0x8] sm:$0xff]  ;;  %243 = vst.msk [vmem:[#allocation6] sm:$0xff] %vm37_vm2, %v241_v24  ;;  %v401_v44 = vmul.f32 %v400_v40, %v383_v36 }
 0x21d   :  { %v452_v31 = vmul.f32 %v451_v22, %v420_v23  ;;  %v381_v43 = vadd.f32 %v378_v32, %v373_v30 }
 0x21f   :  { %v454_v37 = vsub.f32 %v452_v31, %v382_v26  ;;  %v417_v35 = vsub.f32 %v401_v44, %v381_v43 }
 0x221   :  { %v456_v42 = vadd.f32 %v454_v37, %v418_v34 }
 0x223   :  { %v458_v45 = vsub.f32 0.0, %v456_v42  ;;  %v419_v47 = vld [vmem:[#allocation6] sm:$0xff] }
 0x224   :  { %v437_v48 = vmul.f32 %v436_v46, %v419_v47 }
 0x225   :  { %461 = vst.msk [vmem:[%s773_s4 + $0x8] sm:$0xff] %vm37_vm2, %v458_v45 }
 0x226   :  { %v453_v49 = vsub.f32 %v437_v48, %v381_v43 }
 0x228   :  { %v455_v50 = vadd.f32 %v453_v49, %v417_v35 }
 0x22a   :  { %v457_v51 = vsub.f32 0.0, %v455_v50 }
 0x22c   :  { %460 = vst.msk [vmem:[%s773_s4] sm:$0xff] %vm37_vm2, %v457_v51 }
 0x22d   :  { %466 = vsyncpa [#allocation9], 1 }

</bundles_post_ra>
